<compile_context>
chip_gen: v7x
topology: tpu7x:2x2x1
jax: 0.10.0
libtpu: 0.0.40
codegen_flags: <defaults>
</compile_context>

<pallas_src>
import functools

import jax
import jax.numpy as jnp
from jax.experimental import pallas as pl
from jax.experimental.pallas import tpu as pltpu


def manager_kernel(act_ref, wfc_ref, wlstm_ref, wc1_ref, wc2_ref, bias_ref,
                   slab_ref, value_ref, *, num_state, d):
    S = num_state
    H = wc1_ref.shape[1]  # critic hidden (256)

    # --- unpack activation slab [x | hx | cx] -------------------------------
    x = act_ref[:, 0:S]
    hx = act_ref[:, S:S + d]
    cx = act_ref[:, S + d:S + 2 * d]

    # --- unpack bias slab ---------------------------------------------------
    bfc = bias_ref[0:1, 0:d]          # (1, d)
    blstm = bias_ref[1:2, 0:4 * d]    # (1, 4d)  (= b_ih + b_hh)
    bc1 = bias_ref[2:3, 0:H]          # (1, H)
    bc2 = bias_ref[3:4, 0:1]          # (1, 1)

    # --- state = relu(fc(x)) ------------------------------------------------
    s = jnp.dot(x, wfc_ref[...], preferred_element_type=jnp.float32) + bfc
    s = jnp.maximum(s, 0.0)

    # --- fused LSTMCell: gates = [s | hx] @ W_lstm + b_lstm -----------------
    sh = jnp.concatenate([s, hx], axis=1)                       # (B, 2d)
    gates = jnp.dot(sh, wlstm_ref[...],
                    preferred_element_type=jnp.float32) + blstm  # (B, 4d)

    # Full-vreg nonlinearity: sigmoid everywhere, tanh on the g-gate lanes,
    # selected with a lane-iota mask (gate order i, f, g, o).
    lane = jax.lax.broadcasted_iota(jnp.int32, gates.shape, dimension=1)
    g_mask = (lane >= 2 * d) & (lane < 3 * d)
    act_g = jnp.where(g_mask, jnp.tanh(gates), jax.nn.sigmoid(gates))
    i_g = act_g[:, 0 * d:1 * d]
    f_g = act_g[:, 1 * d:2 * d]
    g_g = act_g[:, 2 * d:3 * d]
    o_g = act_g[:, 3 * d:4 * d]

    c_new = f_g * cx + i_g * g_g
    h_new = o_g * jnp.tanh(c_new)
    goal = c_new  # goal = new cell state

    # --- critic: value = fc_critic2(relu(fc_critic1(goal))) -----------------
    v = jnp.dot(goal, wc1_ref[...], preferred_element_type=jnp.float32) + bc1
    v = jnp.maximum(v, 0.0)
    # N=1 head on the VPU/XLU: elementwise mul with the wc2 row + lane reduce.
    value_ref[...] = jnp.sum(v * wc2_ref[...], axis=1, keepdims=True) + bc2

    # TODO(synk): the 5%-probability random goal resampling (np.random /
    # torch.empty().normal_()) is a stochastic training-time branch and is
    # intentionally omitted (deterministic path taken).

    # --- goal = goal / ||goal||_2 (per-row), via EUP rsqrt ------------------
    inv_norm = jax.lax.rsqrt(jnp.sum(goal * goal, axis=1, keepdims=True) + 1e-12)
    goal_n = goal * inv_norm

    # --- single lane-dense output slab: [goal | hx | cx | state] ------------
    slab_ref[...] = jnp.concatenate([goal_n, h_new, c_new, s], axis=1)


def manager_forward(x, hx, cx, packed):
    B, S = x.shape
    d = hx.shape[1]

    # One activation slab -> one input DMA instead of three.
    act = jnp.concatenate([x, hx, cx], axis=1)  # (B, S + 2d)

    vmem = pl.BlockSpec(memory_space=pltpu.MemorySpace.VMEM)

    slab, value = pl.pallas_call(
        functools.partial(manager_kernel, num_state=S, d=d),
        out_shape=(
            jax.ShapeDtypeStruct((B, 4 * d), jnp.float32),  # [goal|hx|cx|state]
            jax.ShapeDtypeStruct((B, 1), jnp.float32),      # value
        ),
        in_specs=[vmem] * 6,
        out_specs=(vmem, vmem),
    )(
        act,
        packed["wfc"], packed["wlstm"], packed["wc1"], packed["wc2_row"],
        packed["bias"],
    )

    goal = slab[:, 0 * d:1 * d]
    hx_o = slab[:, 1 * d:2 * d]
    cx_o = slab[:, 2 * d:3 * d]
    state = slab[:, 3 * d:4 * d]
    return goal, (hx_o, cx_o), value, state


def init_params(key, num_state, d, critic_hidden=256):
    """Deterministic init mimicking nn.Linear / nn.LSTMCell defaults.
    Weights stored transposed: (in_features, out_features)."""
    def uniform(k, shape, bound):
        return jax.random.uniform(k, shape, jnp.float32, -bound, bound)

    ks = jax.random.split(key, 8)
    b_fc = 1.0 / jnp.sqrt(num_state)
    b_lstm = 1.0 / jnp.sqrt(d)
    b_c1 = 1.0 / jnp.sqrt(d)
    b_c2 = 1.0 / jnp.sqrt(critic_hidden)

    return {
        "wfc": uniform(ks[0], (num_state, d), b_fc),
        "bfc": uniform(ks[1], (1, d), b_fc),
        "wih": uniform(ks[2], (d, 4 * d), b_lstm),
        "bih": jnp.zeros((1, 4 * d), jnp.float32),   # module fills bias_ih with 0
        "whh": uniform(ks[3], (d, 4 * d), b_lstm),
        "bhh": jnp.zeros((1, 4 * d), jnp.float32),   # module fills bias_hh with 0
        "wc1": uniform(ks[4], (d, critic_hidden), b_c1),
        "bc1": uniform(ks[5], (1, critic_hidden), b_c1),
        "wc2": uniform(ks[6], (critic_hidden, 1), b_c2),
        "bc2": uniform(ks[7], (1, 1), b_c2),
    }


def pack_params(p, num_state, d, critic_hidden=256):
    """Offline packing: fuse LSTM weights/biases, build one bias slab."""
    del num_state
    wlstm = jnp.concatenate([p["wih"], p["whh"]], axis=0)      # (2d, 4d)
    blstm = p["bih"] + p["bhh"]                                # (1, 4d)

    W = max(critic_hidden, 4 * d)
    bias = jnp.zeros((4, W), jnp.float32)
    bias = bias.at[0, :d].set(p["bfc"][0])
    bias = bias.at[1, :4 * d].set(blstm[0])
    bias = bias.at[2, :critic_hidden].set(p["bc1"][0])
    bias = bias.at[3, 0].set(p["bc2"][0, 0])

    return {
        "wfc": p["wfc"],                 # (S, d)
        "wlstm": wlstm,                  # (2d, 4d)
        "wc1": p["wc1"],                 # (d, 256)
        "wc2_row": p["wc2"].T,           # (1, 256)
        "bias": bias,                    # (4, 256)
    }


if __name__ == "__main__":
    B, num_state, d = 8, 32, 32

    key = jax.random.PRNGKey(0)
    k_x, k_h, k_c, k_p = jax.random.split(key, 4)

    x = jax.random.normal(k_x, (B, num_state), jnp.float32)
    hx = jax.random.normal(k_h, (B, d), jnp.float32)
    cx = jax.random.normal(k_c, (B, d), jnp.float32)
    params = init_params(k_p, num_state, d)
    packed = pack_params(params, num_state, d)

    goal, (hx_o, cx_o), value, state = manager_forward(x, hx, cx, packed)
    jax.block_until_ready((goal, hx_o, cx_o, value, state))

    # quick sanity vs pure-JAX reference (uses the unpacked, logical params)
    def ref(x, hx, cx, p):
        s = jnp.maximum(x @ p["wfc"] + p["bfc"], 0.0)
        g = s @ p["wih"] + p["bih"] + hx @ p["whh"] + p["bhh"]
        i_g, f_g, g_g, o_g = (
            jax.nn.sigmoid(g[:, :d]),
            jax.nn.sigmoid(g[:, d:2 * d]),
            jnp.tanh(g[:, 2 * d:3 * d]),
            jax.nn.sigmoid(g[:, 3 * d:]),
        )
        c_new = f_g * cx + i_g * g_g
        h_new = o_g * jnp.tanh(c_new)
        v = jnp.maximum(c_new @ p["wc1"] + p["bc1"], 0.0) @ p["wc2"] + p["bc2"]
        goal = c_new / jnp.linalg.norm(c_new, axis=1, keepdims=True)
        return goal, h_new, c_new, v, s

    rg, rh, rc, rv, rs = ref(x, hx, cx, params)
    assert jnp.allclose(goal, rg, atol=1e-5)
    assert jnp.allclose(hx_o, rh, atol=1e-5)
    assert jnp.allclose(cx_o, rc, atol=1e-5)
    assert jnp.allclose(value, rv, atol=1e-5)
    assert jnp.allclose(state, rs, atol=1e-5)

    print("KERNEL_OK")
</pallas_src>

<mosaic_0001>
module attributes {stable_mosaic.version = 11 : i64} {
  func.func @manager_kernel(%arg0: memref<8x96xf32, #tpu.memory_space<vmem>>, %arg1: memref<32x32xf32, #tpu.memory_space<vmem>>, %arg2: memref<64x128xf32, #tpu.memory_space<vmem>>, %arg3: memref<32x256xf32, #tpu.memory_space<vmem>>, %arg4: memref<1x256xf32, #tpu.memory_space<vmem>>, %arg5: memref<4x256xf32, #tpu.memory_space<vmem>>, %arg6: memref<8x128xf32, #tpu.memory_space<vmem>>, %arg7: memref<8x1xf32, #tpu.memory_space<vmem>>) attributes {dimension_semantics = [], scalar_prefetch = 0 : i64, scratch_operands = 0 : i64, tpu.core_type = #tpu.core_type<tc>} {
    %c0 = arith.constant 0 : index
    %c0_0 = arith.constant 0 : index
    %0 = vector.load %arg0[%c0, %c0_0] : memref<8x96xf32, #tpu.memory_space<vmem>>, vector<8x32xf32>
    %c0_1 = arith.constant 0 : index
    %c32 = arith.constant 32 : index
    %1 = vector.load %arg0[%c0_1, %c32] : memref<8x96xf32, #tpu.memory_space<vmem>>, vector<8x32xf32>
    %c0_2 = arith.constant 0 : index
    %c64 = arith.constant 64 : index
    %2 = vector.load %arg0[%c0_2, %c64] : memref<8x96xf32, #tpu.memory_space<vmem>>, vector<8x32xf32>
    %c0_3 = arith.constant 0 : index
    %c0_4 = arith.constant 0 : index
    %3 = vector.load %arg5[%c0_3, %c0_4] : memref<4x256xf32, #tpu.memory_space<vmem>>, vector<1x32xf32>
    %c1 = arith.constant 1 : index
    %c0_5 = arith.constant 0 : index
    %4 = vector.load %arg5[%c1, %c0_5] : memref<4x256xf32, #tpu.memory_space<vmem>>, vector<1x128xf32>
    %c2 = arith.constant 2 : index
    %c0_6 = arith.constant 0 : index
    %5 = vector.load %arg5[%c2, %c0_6] : memref<4x256xf32, #tpu.memory_space<vmem>>, vector<1x256xf32>
    %c3 = arith.constant 3 : index
    %c0_7 = arith.constant 0 : index
    %6 = vector.load %arg5[%c3, %c0_7] : memref<4x256xf32, #tpu.memory_space<vmem>>, vector<1x1xf32>
    %c0_8 = arith.constant 0 : index
    %c0_9 = arith.constant 0 : index
    %7 = vector.load %arg1[%c0_8, %c0_9] : memref<32x32xf32, #tpu.memory_space<vmem>>, vector<32x32xf32>
    %cst = arith.constant dense<0.000000e+00> : vector<8x32xf32>
    %8 = tpu.matmul %0, %7, %cst {dimension_numbers = #tpu.dot_dimension_numbers<[1], [0], [0], [1], [0, 0, 1, 1], [], []>} : vector<8x32xf32>, vector<32x32xf32>, vector<8x32xf32> -> vector<8x32xf32>
    %9 = vector.broadcast %3 : vector<1x32xf32> to vector<8x32xf32>
    %10 = arith.addf %8, %9 : vector<8x32xf32>
    %cst_10 = arith.constant 0.000000e+00 : f32
    %11 = vector.broadcast %cst_10 : f32 to vector<8x32xf32>
    %12 = arith.maximumf %10, %11 : vector<8x32xf32>
    %13 = tpu.concatenate %12, %1 in 1 : vector<8x32xf32>, vector<8x32xf32> -> vector<8x64xf32>
    %c0_11 = arith.constant 0 : index
    %c0_12 = arith.constant 0 : index
    %14 = vector.load %arg2[%c0_11, %c0_12] : memref<64x128xf32, #tpu.memory_space<vmem>>, vector<64x128xf32>
    %cst_13 = arith.constant dense<0.000000e+00> : vector<8x128xf32>
    %15 = tpu.matmul %13, %14, %cst_13 {dimension_numbers = #tpu.dot_dimension_numbers<[1], [0], [0], [1], [0, 0, 1, 1], [], []>} : vector<8x64xf32>, vector<64x128xf32>, vector<8x128xf32> -> vector<8x128xf32>
    %16 = vector.broadcast %4 : vector<1x128xf32> to vector<8x128xf32>
    %17 = arith.addf %15, %16 : vector<8x128xf32>
    %18 = tpu.iota {dimensions = array<i32: 1>} : vector<8x128xi32>
    %c64_i32 = arith.constant 64 : i32
    %19 = vector.broadcast %c64_i32 : i32 to vector<8x128xi32>
    %20 = arith.cmpi sge, %18, %19 : vector<8x128xi32>
    %c96_i32 = arith.constant 96 : i32
    %21 = vector.broadcast %c96_i32 : i32 to vector<8x128xi32>
    %22 = arith.cmpi slt, %18, %21 : vector<8x128xi32>
    %23 = arith.andi %20, %22 : vector<8x128xi1>
    %24 = math.tanh %17 : vector<8x128xf32>
    %25 = arith.negf %17 : vector<8x128xf32>
    %26 = math.exp %25 : vector<8x128xf32>
    %cst_14 = arith.constant 1.000000e+00 : f32
    %27 = vector.broadcast %cst_14 : f32 to vector<8x128xf32>
    %28 = arith.addf %27, %26 : vector<8x128xf32>
    %29 = arith.divf %27, %28 : vector<8x128xf32>
    %30 = arith.select %23, %24, %29 : vector<8x128xi1>, vector<8x128xf32>
    %31 = vector.extract_strided_slice %30 {offsets = [0, 0], sizes = [8, 32], strides = [1, 1]} : vector<8x128xf32> to vector<8x32xf32>
    %32 = vector.extract_strided_slice %30 {offsets = [0, 32], sizes = [8, 32], strides = [1, 1]} : vector<8x128xf32> to vector<8x32xf32>
    %33 = vector.extract_strided_slice %30 {offsets = [0, 64], sizes = [8, 32], strides = [1, 1]} : vector<8x128xf32> to vector<8x32xf32>
    %34 = vector.extract_strided_slice %30 {offsets = [0, 96], sizes = [8, 32], strides = [1, 1]} : vector<8x128xf32> to vector<8x32xf32>
    %35 = arith.mulf %32, %2 : vector<8x32xf32>
    %36 = arith.mulf %31, %33 : vector<8x32xf32>
    %37 = arith.addf %35, %36 : vector<8x32xf32>
    %38 = math.tanh %37 : vector<8x32xf32>
    %39 = arith.mulf %34, %38 : vector<8x32xf32>
    %c0_15 = arith.constant 0 : index
    %c0_16 = arith.constant 0 : index
    %40 = vector.load %arg3[%c0_15, %c0_16] : memref<32x256xf32, #tpu.memory_space<vmem>>, vector<32x256xf32>
    %cst_17 = arith.constant dense<0.000000e+00> : vector<8x256xf32>
    %41 = tpu.matmul %37, %40, %cst_17 {dimension_numbers = #tpu.dot_dimension_numbers<[1], [0], [0], [1], [0, 0, 1, 1], [], []>} : vector<8x32xf32>, vector<32x256xf32>, vector<8x256xf32> -> vector<8x256xf32>
    %42 = vector.broadcast %5 : vector<1x256xf32> to vector<8x256xf32>
    %43 = arith.addf %41, %42 : vector<8x256xf32>
    %cst_18 = arith.constant 0.000000e+00 : f32
    %44 = vector.broadcast %cst_18 : f32 to vector<8x256xf32>
    %45 = arith.maximumf %43, %44 : vector<8x256xf32>
    %c0_19 = arith.constant 0 : index
    %c0_20 = arith.constant 0 : index
    %46 = vector.load %arg4[%c0_19, %c0_20] : memref<1x256xf32, #tpu.memory_space<vmem>>, vector<1x256xf32>
    %47 = vector.broadcast %46 : vector<1x256xf32> to vector<8x256xf32>
    %48 = arith.mulf %45, %47 : vector<8x256xf32>
    %cst_21 = arith.constant dense<0.000000e+00> : vector<8xf32>
    %49 = vector.multi_reduction <add>, %48, %cst_21 [1] : vector<8x256xf32> to vector<8xf32>
    %50 = vector.shape_cast %49 : vector<8xf32> to vector<8x1xf32>
    %51 = vector.broadcast %6 : vector<1x1xf32> to vector<8x1xf32>
    %52 = arith.addf %50, %51 : vector<8x1xf32>
    %c0_22 = arith.constant 0 : index
    %c0_23 = arith.constant 0 : index
    %53 = vector.load %arg7[%c0_22, %c0_23] : memref<8x1xf32, #tpu.memory_space<vmem>>, vector<8x1xf32>
    tpu.vector_store %arg7[%c0_22, %c0_23], %52 {strides = array<i32>} : memref<8x1xf32, #tpu.memory_space<vmem>>, vector<8x1xf32>,
    %54 = arith.mulf %37, %37 : vector<8x32xf32>
    %cst_24 = arith.constant dense<0.000000e+00> : vector<8xf32>
    %55 = vector.multi_reduction <add>, %54, %cst_24 [1] : vector<8x32xf32> to vector<8xf32>
    %56 = vector.shape_cast %55 : vector<8xf32> to vector<8x1xf32>
    %cst_25 = arith.constant 9.99999996E-13 : f32
    %57 = vector.broadcast %cst_25 : f32 to vector<8x1xf32>
    %58 = arith.addf %56, %57 : vector<8x1xf32>
    %59 = math.rsqrt %58 : vector<8x1xf32>
    %60 = vector.broadcast %59 : vector<8x1xf32> to vector<8x32xf32>
    %61 = arith.mulf %37, %60 : vector<8x32xf32>
    %62 = tpu.concatenate %61, %39, %37, %12 in 1 : vector<8x32xf32>, vector<8x32xf32>, vector<8x32xf32>, vector<8x32xf32> -> vector<8x128xf32>
    %c0_26 = arith.constant 0 : index
    %c0_27 = arith.constant 0 : index
    %63 = vector.load %arg6[%c0_26, %c0_27] : memref<8x128xf32, #tpu.memory_space<vmem>>, vector<8x128xf32>
    tpu.vector_store %arg6[%c0_26, %c0_27], %62 {strides = array<i32>} : memref<8x128xf32, #tpu.memory_space<vmem>>, vector<8x128xf32>,
    return
  }
}

</mosaic_0001>

<bundles_post_ra>
// kernel: tpu_custom_call.1
= control target key start
LH: loop header
LB: loop body
LE: loop exit
PB: predicated region body
PF: predicated region fallthrough
CT: control target
= control target key end

     0   :  { %13 = vsyncpa [#allocation3], 0  ;;  %s851_s0 = inlined_call_operand.hbm [shape: f32[8,96], index: 0, kind: input, shape index: {}]   ;;  %s852_s1 = inlined_call_operand.hbm [shape: f32[32,32], index: 1, kind: input, shape index: {}]   ;;  %s853_s2 = inlined_call_operand.hbm [shape: f32[64,128], index: 2, kind: input, shape index: {}]   ;;  %s854_s3 = inlined_call_operand.hbm [shape: f32[32,256], index: 3, kind: input, shape index: {}]   ;;  %s855_s4 = inlined_call_operand.vmem [shape: f32[1,256], index: 4, kind: input, shape index: {}]   ;;  %s856_s5 = inlined_call_operand.vmem [shape: f32[4,256], index: 5, kind: input, shape index: {}]   ;;  %s857_s6 = inlined_call_operand.hbm [shape: f32[8,128], index: 6, kind: output, shape index: {0}]   ;;  %s858_s7 = inlined_call_operand.vmem [shape: f32[8,1], index: 7, kind: output, shape index: {1}]  }
   0x1   :  { %14 = vsyncpa [#allocation6], 0 }
   0x2   :  { %15 = vsyncpa [#allocation9], 0 }
   0x3   :  { %16 = vsyncpa [#allocation4], 0  ;;  %s682_s24 = smov [#allocation5]   ;;  %s564_s28 = scalar_lea.hbm %s852_s1, 512 }
   0x4   :  { %s32_s25 = sshll.u32 %s682_s24, 4  ;;  %p565_p0 = scmp.ne.s32.totalorder %s852_s1, %s564_s28  ;;  %s33_s25 = int_to_ptr.vmem [resolvable:$true] %s32_s25 }
   0x5   :  { %p568_p1 = scmp.lt.u32.totalorder %s564_s28, %s852_s1 }
   0x7   :  { %p570_p2 = pnand %p568_p1, %p565_p0 }
   0x9   :  { %573 = shalt.err (!%p570_p2)
}
   0xa   :  { %s574_s10 = scalar_lea.vmem %s33_s25, 512  ;;  %p579_p4 = scmp.lt.s32.totalorder %s33_s25, %s33_s25 }
   0xb   :  { %p575_p3 = scmp.ne.s32.totalorder %s33_s25, %s574_s10  ;;  %p580_p5 = scmp.lt.s32.totalorder %s574_s10, %s574_s10 }
   0xd   :  { %p581_p6 = por %p580_p5, %p579_p4 }
   0xf   :  { %p582_p7 = pnand %p581_p6, %p575_p3 }
  0x11   :  { %585 = shalt.err (!%p582_p7)
}
  0x12   :  { %s683_s11 = smov 128   ;;  %s684_s12 = smov 8  }
  0x13   :  { %38 = dma.hbm_to_vmem [thread:$0]  %s852_s1, 512, %s33_s25, [#allocation6], %s683_s11, %s683_s11, %s684_s12  }
  0x14   :  { %s685_s15 = smov [#allocation2]   ;;  %s686_s17 = smov [#allocation7]  }
  0x15   :  { %s23_s16 = sshll.u32 %s685_s15, 4  ;;  %s44_s18 = sshll.u32 %s686_s17, 4  ;;  %s24_s16 = int_to_ptr.vmem [resolvable:$true] %s23_s16  ;;  %s45_s18 = int_to_ptr.vmem [resolvable:$true] %s44_s18 }
  0x16   :  { %s586_s21 = scalar_lea.hbm %s851_s0, 128 }
  0x17   :  { %p587_p8 = scmp.ne.s32.totalorder %s851_s0, %s586_s21  ;;  %p590_p9 = scmp.lt.u32.totalorder %s586_s21, %s851_s0 }
  0x19   :  { %p592_p10 = pnand %p590_p9, %p587_p8 }
  0x1b   :  { %595 = shalt.err (!%p592_p10)
}
  0x1c   :  { %s596_s1 = scalar_lea.vmem %s24_s16, 128  ;;  %p601_p12 = scmp.lt.s32.totalorder %s24_s16, %s24_s16 }
  0x1d   :  { %p597_p11 = scmp.ne.s32.totalorder %s24_s16, %s596_s1  ;;  %p602_p13 = scmp.lt.s32.totalorder %s596_s1, %s596_s1 }
  0x1f   :  { %p603_p0 = por %p602_p13, %p601_p12 }
  0x21   :  { %p604_p1 = pnand %p603_p0, %p597_p11 }
  0x23   :  { %607 = shalt.err (!%p604_p1)
}
  0x24   :  { %26 = dma.hbm_to_vmem [thread:$0]  %s851_s0, 128, %s24_s16, [#allocation3]  }
  0x25   :  { %s608_s30 = scalar_lea.hbm %s853_s2, 1024 }
  0x26   :  { %p609_p2 = scmp.ne.s32.totalorder %s853_s2, %s608_s30  ;;  %p612_p3 = scmp.lt.u32.totalorder %s608_s30, %s853_s2 }
  0x28   :  { %p614_p4 = pnand %p612_p3, %p609_p2 }
  0x2a   :  { %617 = shalt.err (!%p614_p4)
}
  0x2b   :  { %s618_s14 = scalar_lea.vmem %s45_s18, 1024  ;;  %p623_p6 = scmp.lt.s32.totalorder %s45_s18, %s45_s18 }
  0x2c   :  { %p619_p5 = scmp.ne.s32.totalorder %s45_s18, %s618_s14  ;;  %p624_p7 = scmp.lt.s32.totalorder %s618_s14, %s618_s14 }
  0x2e   :  { %p625_p8 = por %p624_p7, %p623_p6 }
  0x30   :  { %p626_p9 = pnand %p625_p8, %p619_p5 }
  0x32   :  { %629 = shalt.err (!%p626_p9)
}
  0x33   :  { %50 = dma.hbm_to_vmem [thread:$0]  %s853_s2, 1024, %s45_s18, [#allocation6], %s683_s11, %s683_s11, %s684_s12  }
  0x34   :  { %s687_s16 = smov [#allocation8]   ;;  %s630_s21 = scalar_lea.hbm %s854_s3, 1024 }
  0x35   :  { %s56_s17 = sshll.u32 %s687_s16, 4  ;;  %p631_p10 = scmp.ne.s32.totalorder %s854_s3, %s630_s21  ;;  %s57_s17 = int_to_ptr.vmem [resolvable:$true] %s56_s17 }
  0x36   :  { %p634_p11 = scmp.lt.u32.totalorder %s630_s21, %s854_s3 }
  0x38   :  { %p636_p12 = pnand %p634_p11, %p631_p10 }
  0x3a   :  { %639 = shalt.err (!%p636_p12)
}
  0x3b   :  { %s640_s1 = scalar_lea.vmem %s57_s17, 1024  ;;  %p645_p0 = scmp.lt.s32.totalorder %s57_s17, %s57_s17 }
  0x3c   :  { %p641_p13 = scmp.ne.s32.totalorder %s57_s17, %s640_s1  ;;  %p646_p1 = scmp.lt.s32.totalorder %s640_s1, %s640_s1 }
  0x3e   :  { %p647_p2 = por %p646_p1, %p645_p0 }
  0x40   :  { %p648_p3 = pnand %p647_p2, %p641_p13 }
  0x42   :  { %651 = shalt.err (!%p648_p3)
}
  0x43   :  { %s688_s2 = smov 256   ;;  %s689_s11 = smov 16  }
  0x44   :  { %62 = dma.hbm_to_vmem [thread:$0]  %s854_s3, 1024, %s57_s17, [#allocation9], %s688_s2, %s688_s2, %s689_s11  }
  0x45   :  { %674 = dma.done.wait [#allocation3], 128  }
  0x46   :  { %675 = vsyncadd [#allocation3], 4294967168 }
  0x47   :  { %676 = dma.done.wait [#allocation6], 1536  }
  0x48   :  { %677 = vsyncadd [#allocation6], 4294965760 }
  0x49   :  { %678 = dma.done.wait [#allocation9], 1024  }
  0x4a   :  { %679 = vsyncadd [#allocation9], 4294966272  ;;  %v690_v0 = vmov 0.0|0.0   ;;  %vm691_vm0 = vmmov 0   ;;  %v692_v1 = vmov 0.0   ;;  %v85_v2 = vld [vmem:[#allocation5] sm:$0xff]  ;;  %v255_v33 = vlaneseq }
  0x4b   :  { %513 = vmatprep.subr.bf16.mxu0 %v690_v0  ;;  %491 = vmatprep.mubr.msk.f32.mxu0 %vm691_vm0, %v692_v1  ;;  %v86_v3 = vld [vmem:[#allocation5 + $0x8] sm:$0xff]  ;;  %v87_v4 = vld [vmem:[#allocation5 + $0x10] sm:$0xff]  ;;  %v88_v6 = vld [vmem:[#allocation5 + $0x18] sm:$0xff]  ;;  %vm93_vm1 = vcmask 261120   ;;  %vm181_vm2 = vcmask 523264   ;;  %s693_s29 = smov 64  }
  0x4c   :  { %519 = vmatprep.subr.bf16.mxu1 %v690_v0  ;;  %510 = vmatprep.mubr.msk.f32.mxu1 %vm691_vm0, %v692_v1  ;;  %v514_v5 = vpack.c.bf16 %v86_v3, %v85_v2  ;;  %v169_v7 = vld [vmem:[#allocation7] sm:$0xff]  ;;  %v170_v8 = vld [vmem:[#allocation7 + $0x8] sm:$0xff]  ;;  %v171_v9 = vld [vmem:[#allocation7 + $0x10] sm:$0xff]  ;;  %v517_v11 = vpack.c.bf16 %v88_v6, %v87_v4  ;;  %v256_v35 = vand.u32 127, %v255_v33  ;;  %s694_s30 = smov 96   ;;  %s695_s8 = smov 32  }
  0x4d   :  { %v172_v10 = vld [vmem:[#allocation7 + $0x18] sm:$0xff]  ;;  %v520_v12 = vpack.c.bf16 %v170_v8, %v169_v7  ;;  %v173_v14 = vld [vmem:[#allocation7 + $0x20] sm:$0xff]  ;;  %v174_v15 = vld [vmem:[#allocation7 + $0x28] sm:$0xff]  ;;  %v298_v2 = vshrl.u32 %v255_v33, 7  ;;  %vm407_vm6 = vcmask 7168   ;;  %s696_s17 = smov [#allocation10]  }
  0x4e   :  { %515 = vmatpush3.bf16.msra.mxu0 %v514_v5  ;;  %v523_v13 = vpack.c.bf16 %v172_v10, %v171_v9  ;;  %v79_v16 = vld [vmem:[#allocation2] sm:$0xff]  ;;  %v526_v17 = vpack.c.bf16 %v174_v15, %v173_v14  ;;  %v175_v18 = vld [vmem:[#allocation7 + $0x30] sm:$0xff]  ;;  %vm257_vm3 = vcmp.ge.s32.totalorder %v256_v35, 64  ;;  %vm258_vm4 = vcmp.lt.s32.totalorder %v256_v35, 96  ;;  %v289_v41 = vld [vmem:[#allocation8 + $0x8] sm:$0xff]  ;;  %s446_s19 = sshll.u32 %s696_s17, 4  ;;  %s447_s19 = int_to_ptr.vmem [resolvable:$true] %s446_s19 }
  0x4f   :  { %516 = vmatprep.subr.bf16.mxu0 %v690_v0  ;;  %521 = vmatpush3.bf16.msra.mxu1 %v520_v12  ;;  %v176_v19 = vld [vmem:[#allocation7 + $0x38] sm:$0xff]  ;;  %vm259_vm5 = vmand %vm257_vm3, %vm258_vm4  ;;  %v288_v43 = vld [vmem:[#allocation8] sm:$0xff]  ;;  %v299_v3 = vsub.s32 0, %v298_v2  ;;  %v303_v5 = vsub.s32 1, %v298_v2  ;;  %vm437_vm7 = vcmask 785408   ;;  %p657_p5 = scmp.lt.s32.totalorder %s447_s19, %s447_s19 }
  0x50   :  { %522 = vmatprep.subr.bf16.mxu1 %v690_v0  ;;  %v529_v20 = vpack.c.bf16 %v176_v19, %v175_v18  ;;  %v462_v21 = vld [vmem:[%s856_s5] ss:$0 sm:$0xff]  ;;  %v464_v27 = vld [vmem:[%s856_s5 + $0x1] ss:$0 sm:$0xff]  ;;  %v290_v45 = vld [vmem:[#allocation8 + $0x10] sm:$0xff] }
  0x51   :  { %v291_v42 = vld [vmem:[#allocation8 + $0x18] sm:$0xff]  ;;  %v293_v46 = vld [vmem:[#allocation8 + $0x28] sm:$0xff]  ;;  %v533_v48 = vpack.c.bf16 %v290_v45, %v288_v43  ;;  %v292_v50 = vld [vmem:[#allocation8 + $0x20] sm:$0xff] }
  0x52   :  { %518 = vmatpush3.bf16.msra.mxu0 %v517_v11  ;;  %v531_v44 = vpack.c.bf16 %v291_v42, %v289_v41  ;;  %v295_v47 = vld [vmem:[#allocation8 + $0x38] sm:$0xff]  ;;  %v294_v51 = vld [vmem:[#allocation8 + $0x30] sm:$0xff] }
  0x53   :  { %524 = vmatpush3.bf16.msra.mxu1 %v523_v13  ;;  %v535_v49 = vpack.c.bf16 %v295_v47, %v293_v46  ;;  %v537_v52 = vpack.c.bf16 %v294_v51, %v292_v50  ;;  %v461_v4 = vld [vmem:[%s856_s5 + $0x2] ss:$4 sm:$0x3]  ;;  %v385_v7 = vld [vmem:[%s855_s4] sm:$0x3] }
  0x54   :  { %525 = vmatprep.subr.bf16.mxu1 %v690_v0  ;;  %532 = vmatprep.subr.bf16.mxu0 %v531_v44  ;;  %v300_v6 = vrot.slane %v461_v4, %v299_v3  ;;  %v304_v8 = vrot.slane %v461_v4, %v303_v5  ;;  %v390_v11 = vrot.slane %v385_v7, %v299_v3 }
  0x55   :  { %492 = vmatmul.mubr.msk.f32.vlgmr.msra.gmra.mrb[0].mxu0 %vm93_vm1, %v79_v16  ;;  %v394_v14 = vrot.slane %v385_v7, %v303_v5 }
  0x56   :  { %376 = vmatprep.mubr.f32.mxu0 %v692_v1  ;;  %534 = vmatpush1.bf16.msra.mxu0 %v533_v48 }
  0x57   :  { %527 = vmatpush3.bf16.msra.mxu1 %v526_v17  ;;  %536 = vmatprep.subr.bf16.mxu0 %v535_v49 }
  0x58   :  { %528 = vmatprep.subr.bf16.mxu1 %v690_v0 }
  0x5a   :  { %538 = vmatpush1.bf16.msra.mxu0 %v537_v52 }
  0x5b   :  { %530 = vmatpush3.bf16.msra.mxu1 %v529_v20 }
 0x128   :  { %v163_v22 = vpop.f32.mrb[0].mxu0 }
 0x129   :  { %v795_v23 = vadd.f32 %v462_v21, %v163_v22  ;;  %v493_v24 = vpop.f32.mrb[1].mxu0 }
 0x12b   :  { %v167_v25 = vmax.f32 %v795_v23, 0.0  ;;  %v468_v23 = vld [vmem:[%s856_s5 + $0x3] ss:$0 sm:$0xff]  ;;  %s652_s5 = scalar_lea.vmem %s447_s19, 128 }
 0x12c   :  { %p653_p4 = scmp.ne.s32.totalorder %s447_s19, %s652_s5  ;;  %p658_p6 = scmp.lt.s32.totalorder %s652_s5, %s652_s5 }
 0x12d   :  { %v168_v26 = vsel %vm93_vm1, %v167_v25, %v79_v16 }
 0x12e   :  { %511 = vmatmul.mubr.msk.f32.vlgmr.msra.gmra.mrb[0].mxu1 %vm181_vm2, %v168_v26  ;;  %p659_p7 = por %p658_p6, %p657_p5 }
 0x130   :  { %p660_p8 = pnand %p659_p7, %p653_p4 }
 0x201   :  { %v251_v28 = vpop.f32.mrb[0].mxu1 }
 0x202   :  { %v252_v29 = vadd.f32 %v464_v27, %v251_v28  ;;  %v512_v30 = vpop.f32.mrb[1].mxu1 }
 0x204   :  { %v466_v31 = vmul.f32 -1.442695, %v252_v29 }
 0x206   :  { %554 = vpow2.f32 %v466_v31 }
 0x207   :  { %556 = vtanh.f32 %v252_v29 }
 0x210   :  { %v555_v32 = vpop.eup %554 }
 0x211   :  { %v264_v34 = vadd.f32 1.0, %v555_v32  ;;  %v557_v36 = vpop.eup %556 }
 0x213   :  { %558 = vrcp.f32 %v264_v34 }
 0x21d   :  { %v559_v37 = vpop.eup %558 }
 0x21e   :  { %v805_v38 = vsel %vm259_vm5, %v557_v36, %v559_v37 }
 0x21f   :  { %273 = vrot.lane.b32.xlu0 %v805_v38, %s693_s29 }
 0x223   :  { %268 = vrot.lane.b32.xlu0 %v79_v16, %s694_s30 }
 0x291   :  { %v274_v39 = vpop.permute.xlu0 %273 }
 0x292   :  { %v276_v40 = vmul.f32 %v274_v39, %v805_v38 }
 0x294   :  { %278 = vrot.lane.b32.xlu1 %v276_v40, %s695_s8 }
 0x295   :  { %v269_v53 = vpop.permute.xlu0 %268 }
 0x296   :  { %v271_v54 = vmul.f32 %v269_v53, %v805_v38 }
 0x306   :  { %v279_v55 = vpop.permute.xlu1 %278 }
 0x307   :  { %v281_v56 = vadd.f32 %v279_v55, %v271_v54 }
 0x309   :  { %560 = vtanh.f32 %v281_v56  ;;  %308 = vrot.lane.b32.xlu1 %v281_v56, %s694_s30  ;;  %v409_v57 = vmul.f32 %v281_v56, %v281_v56 }
 0x30b   :  { %411 = vrot.lane.b32.xlu0 %v409_v57, %s694_s30 }
 0x313   :  { %v561_v58 = vpop.eup %560 }
 0x314   :  { %284 = vrot.lane.b32.xlu0 %v561_v58, %s693_s29 }
 0x37b   :  { %v309_v59 = vpop.permute.xlu1 %308 }
 0x37c   :  { %467 = vmatmul.mubr.msk.f32.vlgmr.msra.gmra.mrb[2].mxu0 %vm93_vm1, %v309_v59 }
 0x37d   :  { %v412_v60 = vpop.permute.xlu0 %411 }
 0x37e   :  { %v414_v61 = vsel %vm93_vm1, %v412_v60, 0.0 }
 0x37f   :  { %415 = vadd.xlane.f32.xlu1 %v414_v61 }
 0x386   :  { %v285_v20 = vpop.permute.xlu0 %284 }
 0x387   :  { %v287_v21 = vmul.f32 %v285_v20, %v805_v38 }
 0x40c   :  { %v416_v62 = vpop.xlane.xlu1 %415 }
 0x40d   :  { %v417_v63 = vadd.f32 1e-12, %v416_v62 }
 0x40f   :  { %562 = vrsqrt.f32 %v417_v63 }
 0x419   :  { %v563_v0 = vpop.eup %562 }
 0x41a   :  { %v419_v1 = vmul.f32 %v563_v0, %v281_v56 }
 0x41c   :  { %421 = vrot.lane.b32.xlu1 %v419_v1, %s694_s30 }
 0x420   :  { %428 = vrot.lane.b32.xlu1 %v281_v56, %s695_s8 }
 0x424   :  { %432 = vrot.lane.b32.xlu1 %v167_v25, %s694_s30 }
 0x44f   :  { %v378_v9 = vpop.f32.mrb[2].mxu0 }
 0x450   :  { %v379_v10 = vadd.f32 %v378_v9, %v300_v6  ;;  %v380_v12 = vpop.f32.mrb[3].mxu0 }
 0x451   :  { %v381_v13 = vadd.f32 %v380_v12, %v304_v8 }
 0x452   :  { %v383_v15 = vmax.f32 %v379_v10, 0.0 }
 0x453   :  { %v384_v16 = vmax.f32 %v381_v13, 0.0 }
 0x454   :  { %v397_v17 = vmul.f32 %v390_v11, %v383_v15 }
 0x455   :  { %v398_v18 = vmul.f32 %v394_v14, %v384_v16 }
 0x457   :  { %v399_v19 = vadd.f32 %v398_v18, %v397_v17 }
 0x459   :  { %400 = vadd.xlane.f32.xlu0 %v399_v19 }
 0x46f   :  { %425 = vrot.lane.b32.xlu0 %v287_v21, %s693_s29 }
 0x48e   :  { %v422_v22 = vpop.permute.xlu1 %421 }
 0x492   :  { %v429_v24 = vpop.permute.xlu1 %428 }
 0x496   :  { %v433_v29 = vpop.permute.xlu1 %432 }
 0x4e6   :  { %v401_v25 = vpop.xlane.xlu0 %400 }
 0x4e7   :  { %v406_v26 = vadd.f32 %v468_v23, %v401_v25 }
 0x4e9   :  { %408 = vst.msk [vmem:[%s858_s7] sm:$0xff] %vm407_vm6, %v406_v26 }
 0x4ea   :  { %v426_v27 = vpop.permute.xlu0 %425 }
 0x4eb   :  { %v435_v28 = vsel %vm93_vm1, %v422_v22, %v426_v27 }
 0x4ec   :  { %v436_v30 = vsel %vm181_vm2, %v435_v28, %v429_v24 }
 0x4ed   :  { %v438_v31 = vsel %vm437_vm7, %v436_v30, %v433_v29 }
 0x4ee   :  { %439 = vst [vmem:[#allocation10] sm:$0xff] %v438_v31 }
 0x4ef   :  { %663 = shalt.err (!%p660_p8)
}
 0x4f0   :  { %s664_s21 = scalar_lea.hbm %s857_s6, 128 }
 0x4f1   :  { %p665_p9 = scmp.ne.s32.totalorder %s857_s6, %s664_s21  ;;  %p668_p10 = scmp.lt.u32.totalorder %s664_s21, %s857_s6 }
 0x4f3   :  { %p670_p11 = pnand %p668_p10, %p665_p9 }
 0x4f5   :  { %673 = shalt.err (!%p670_p11)
}
 0x4f6   :  { %449 = dma.vmem_to_hbm [thread:$0]  %s447_s19, 128, %s857_s6, [#allocation4]  }
 0x4f7   :  { %680 = dma.done.wait [#allocation4], 128  }
 0x4f8   :  { %681 = vsyncadd [#allocation4], 4294967168 }
 0x4f9   :  { %457 = vsyncpa [#allocation3], 1 }
 0x4fa   :  { %458 = vsyncpa [#allocation6], 1 }
 0x4fb   :  { %459 = vsyncpa [#allocation9], 1 }
 0x4fc   :  { %460 = vsyncpa [#allocation4], 1 }

</bundles_post_ra>
